<compile_context>
chip_gen: v6e
topology: v6e:2x2x1
jax: 0.10.0
libtpu: 0.0.40
codegen_flags: <defaults>
</compile_context>

<pallas_src>
import jax
import jax.numpy as jnp
from jax.experimental import pallas as pl
from jax.experimental.pallas import tpu as pltpu


# --------------------------------------------------------------------------------------
# Kernel
# --------------------------------------------------------------------------------------
def _mlp_kernel(xt_ref, w1_ref, b1_ref, w23_ref, b23_ref, o_ref):
    # Feature-major: batch on the 128-lane axis.
    xt = xt_ref[...]                                                     # (10, TB)  compute dtype
    # fc1 + ReLU  (f32 accumulate / f32 epilogue: v5e has no bf16 VPU)
    h1 = jnp.dot(w1_ref[...], xt, preferred_element_type=jnp.float32)   # (16, TB)  f32
    h1 = jnp.maximum(h1 + b1_ref[...], 0.0)
    # fused fc2∘fc3 (exact fold: no nonlinearity between them in the reference) + ReLU
    y = jnp.dot(w23_ref[...], h1.astype(w23_ref.dtype),
                preferred_element_type=jnp.float32)                      # (1, TB)   f32
    y = jnp.maximum(y + b23_ref[...], 0.0)
    # Sigmoid via tanh: single EUP push instead of exp + reciprocal; lane-dense store.
    o_ref[...] = 0.5 * jnp.tanh(0.5 * y) + 0.5


# --------------------------------------------------------------------------------------
# Tile-size selection (adaptive: amortize per-step overhead without padding blowup)
# --------------------------------------------------------------------------------------
_TB_CANDIDATES = (65536, 32768, 16384, 8192)


def _pick_tile_b(B, tile_b, max_tile_b):
    if tile_b is not None:
        tb = max(128, min(int(tile_b), int(max_tile_b)))
        return ((tb + 127) // 128) * 128
    b128 = ((B + 127) // 128) * 128
    if b128 <= max_tile_b:
        return b128                          # whole batch fits in one lane tile
    best = None
    for cand in _TB_CANDIDATES:
        if cand > max_tile_b:
            continue
        bp = ((B + cand - 1) // cand) * cand
        if (bp - B) <= 0.05 * B:
            return cand                      # largest candidate with <=5% tail padding
        if best is None or bp < best[1]:
            best = (cand, bp)
    return best[0] if best is not None else b128


# --------------------------------------------------------------------------------------
# Wrapper
# --------------------------------------------------------------------------------------
def presence_classifier_forward(x, params, *, tile_b=None, compute_dtype=None,
                                min_pallas_batch=2048, max_tile_b=65536):
    """x: (B, 10) float32; params in PyTorch nn.Linear convention (see init_params)."""
    B = x.shape[0]

    # Small-batch dispatch: XLA fuses this MLP into one tiny fusion; a pallas_call launch
    # would be pure overhead there.
    if B < min_pallas_batch:
        return reference_forward(x, params)

    if compute_dtype is None:
        # bf16 x halves the binding HBM stream at large B; f32 otherwise (bit-exact).
        compute_dtype = jnp.bfloat16 if B >= 8192 else jnp.float32
    compute_dtype = jnp.dtype(compute_dtype)

    # --- param prep (once; exact algebra in f32, cast only the dot operands) ----------
    w1 = params["w1"].astype(compute_dtype)                                   # (16, 10)
    b1 = params["b1"].reshape(16, 1).astype(jnp.float32)                      # (16, 1)
    w23 = (params["w3"] @ params["w2"]).astype(compute_dtype)                 # (1, 16) = W3 @ W2
    b23 = (params["w3"] @ params["b2"] + params["b3"]).reshape(1, 1).astype(jnp.float32)

    # --- feature-major x: fused transpose + cast + pad (single HBM pass) --------------
    TB = _pick_tile_b(B, tile_b, max_tile_b)
    Bp = pl.cdiv(B, TB) * TB
    xt = jnp.pad(x.T.astype(compute_dtype), ((0, 0), (0, Bp - B)))           # (10, Bp)

    # --- VMEM budget: double-buffered x (sublane-padded to 16 rows), f32 h1 temp,
    #     double-buffered (sublane-padded) output.  Raise the scoped limit only if needed
    #     so the default stays well inside v7x's 64 MiB physical VMEM.
    bytes_per_col = 2 * 16 * compute_dtype.itemsize + 16 * 4 + 2 * 8 * 4
    vmem_est = TB * bytes_per_col + (2 << 20)
    cp_kwargs = dict(dimension_semantics=("parallel",))   # megacore sharding on v7x
    if vmem_est > (30 << 20):
        cp_kwargs["vmem_limit_bytes"] = int(min(vmem_est, 60 << 20))

    out = pl.pallas_call(
        _mlp_kernel,
        out_shape=jax.ShapeDtypeStruct((1, Bp), jnp.float32),
        grid=(Bp // TB,),
        in_specs=[
            pl.BlockSpec((10, TB), lambda i: (0, i)),   # x tile: pipelined over batch
            pl.BlockSpec((16, 10), lambda i: (0, 0)),   # weights: constant index_map,
            pl.BlockSpec((16, 1), lambda i: (0, 0)),    #   VMEM-resident across steps
            pl.BlockSpec((1, 16), lambda i: (0, 0)),
            pl.BlockSpec((1, 1), lambda i: (0, 0)),
        ],
        out_specs=pl.BlockSpec((1, TB), lambda i: (0, i)),  # lane-dense output
        compiler_params=pltpu.CompilerParams(**cp_kwargs),
    )(xt, w1, b1, w23, b23)

    return out[0, :B].reshape(B, 1)


# --------------------------------------------------------------------------------------
# Params / reference
# --------------------------------------------------------------------------------------
def init_params(key):
    """Deterministic synthetic init in PyTorch nn.Linear convention: weight (out, in), bias (out,)."""
    ks = jax.random.split(key, 6)

    def linear(kw, kb, fan_in, fan_out):
        bound = 1.0 / jnp.sqrt(fan_in)
        w = jax.random.uniform(kw, (fan_out, fan_in), jnp.float32, -bound, bound)
        b = jax.random.uniform(kb, (fan_out,), jnp.float32, -bound, bound)
        return w, b

    w1, b1 = linear(ks[0], ks[1], 10, 16)
    w2, b2 = linear(ks[2], ks[3], 16, 8)
    w3, b3 = linear(ks[4], ks[5], 8, 1)
    return {"w1": w1, "b1": b1, "w2": w2, "b2": b2, "w3": w3, "b3": b3}


def reference_forward(x, params):
    """Pure-JAX reference reproducing the PyTorch forward exactly (unfused, f32)."""
    h = jnp.maximum(x @ params["w1"].T + params["b1"], 0.0)
    h = h @ params["w2"].T + params["b2"]
    h = jnp.maximum(h @ params["w3"].T + params["b3"], 0.0)
    return jax.nn.sigmoid(h)


# --------------------------------------------------------------------------------------
# Self-test
# --------------------------------------------------------------------------------------
if __name__ == "__main__":
    key = jax.random.PRNGKey(0)
    k_params, k_x1, k_x2 = jax.random.split(key, 3)

    params = init_params(k_params)

    # Small batch, force the Pallas path (min_pallas_batch=0), f32: algebraic fold is exact.
    x = jax.random.normal(k_x1, (8, 10), dtype=jnp.float32)
    ref = reference_forward(x, params)
    out = jax.block_until_ready(
        presence_classifier_forward(x, params, min_pallas_batch=0,
                                    compute_dtype=jnp.float32))
    assert out.shape == (8, 1)
    assert jnp.allclose(out, ref, atol=1e-5, rtol=1e-5), (out, ref)

    # Non-multiple-of-128 batch exercising tail padding + bf16 MXU path (looser tolerance).
    x2 = jax.random.normal(k_x2, (300, 10), dtype=jnp.float32)
    ref2 = reference_forward(x2, params)
    out2 = jax.block_until_ready(
        presence_classifier_forward(x2, params, min_pallas_batch=0,
                                    compute_dtype=jnp.bfloat16))
    assert out2.shape == (300, 1)
    assert jnp.allclose(out2, ref2, atol=3e-2, rtol=3e-2)

    # Default small-batch dispatch (plain-XLA path) must also match.
    out3 = jax.block_until_ready(presence_classifier_forward(x, params))
    assert jnp.allclose(out3, ref, atol=1e-6, rtol=1e-6)

    print("KERNEL_OK")
</pallas_src>

<mosaic_0001>
module attributes {stable_mosaic.version = 11 : i64} {
  func.func @_mlp_kernel(%arg0: i32, %arg1: memref<10x128xf32, #tpu.memory_space<vmem>>, %arg2: memref<16x10xf32, #tpu.memory_space<vmem>>, %arg3: memref<16x1xf32, #tpu.memory_space<vmem>>, %arg4: memref<1x16xf32, #tpu.memory_space<vmem>>, %arg5: memref<1x1xf32, #tpu.memory_space<vmem>>, %arg6: memref<1x128xf32, #tpu.memory_space<vmem>>) attributes {dimension_semantics = [#tpu.dimension_semantics<parallel>], iteration_bounds = array<i64: 1>, scalar_prefetch = 0 : i64, scratch_operands = 0 : i64, tpu.core_type = #tpu.core_type<tc>, window_params = [{transform_indices = @transform_0, window_bounds = array<i64: 10, 128>}, {pipeline_mode = #tpu.pipeline_mode<synchronous>, transform_indices = @transform_1, window_bounds = array<i64: 16, 10>}, {pipeline_mode = #tpu.pipeline_mode<synchronous>, transform_indices = @transform_2, window_bounds = array<i64: 16, 1>}, {pipeline_mode = #tpu.pipeline_mode<synchronous>, transform_indices = @transform_3, window_bounds = array<i64: 1, 16>}, {pipeline_mode = #tpu.pipeline_mode<synchronous>, transform_indices = @transform_4, window_bounds = array<i64: 1, 1>}, {transform_indices = @transform_5, window_bounds = array<i64: 1, 128>}]} {
    %c0 = arith.constant 0 : index
    %c0_0 = arith.constant 0 : index
    %0 = vector.load %arg1[%c0, %c0_0] : memref<10x128xf32, #tpu.memory_space<vmem>>, vector<10x128xf32>
    %c0_1 = arith.constant 0 : index
    %c0_2 = arith.constant 0 : index
    %1 = vector.load %arg2[%c0_1, %c0_2] : memref<16x10xf32, #tpu.memory_space<vmem>>, vector<16x10xf32>
    %cst = arith.constant dense<0.000000e+00> : vector<16x128xf32>
    %2 = tpu.matmul %1, %0, %cst {dimension_numbers = #tpu.dot_dimension_numbers<[1], [0], [0], [1], [0, 0, 1, 1], [], []>} : vector<16x10xf32>, vector<10x128xf32>, vector<16x128xf32> -> vector<16x128xf32>
    %c0_3 = arith.constant 0 : index
    %c0_4 = arith.constant 0 : index
    %3 = vector.load %arg3[%c0_3, %c0_4] : memref<16x1xf32, #tpu.memory_space<vmem>>, vector<16x1xf32>
    %4 = vector.broadcast %3 : vector<16x1xf32> to vector<16x128xf32>
    %5 = arith.addf %2, %4 : vector<16x128xf32>
    %cst_5 = arith.constant 0.000000e+00 : f32
    %6 = vector.broadcast %cst_5 : f32 to vector<16x128xf32>
    %7 = arith.maximumf %5, %6 : vector<16x128xf32>
    %c0_6 = arith.constant 0 : index
    %c0_7 = arith.constant 0 : index
    %8 = vector.load %arg4[%c0_6, %c0_7] : memref<1x16xf32, #tpu.memory_space<vmem>>, vector<1x16xf32>
    %cst_8 = arith.constant dense<0.000000e+00> : vector<1x128xf32>
    %9 = tpu.matmul %8, %7, %cst_8 {dimension_numbers = #tpu.dot_dimension_numbers<[1], [0], [0], [1], [0, 0, 1, 1], [], []>} : vector<1x16xf32>, vector<16x128xf32>, vector<1x128xf32> -> vector<1x128xf32>
    %c0_9 = arith.constant 0 : index
    %c0_10 = arith.constant 0 : index
    %10 = vector.load %arg5[%c0_9, %c0_10] : memref<1x1xf32, #tpu.memory_space<vmem>>, vector<1x1xf32>
    %11 = vector.broadcast %10 : vector<1x1xf32> to vector<1x128xf32>
    %12 = arith.addf %9, %11 : vector<1x128xf32>
    %cst_11 = arith.constant 0.000000e+00 : f32
    %13 = vector.broadcast %cst_11 : f32 to vector<1x128xf32>
    %14 = arith.maximumf %12, %13 : vector<1x128xf32>
    %cst_12 = arith.constant 5.000000e-01 : f32
    %15 = vector.broadcast %cst_12 : f32 to vector<1x128xf32>
    %16 = arith.mulf %15, %14 : vector<1x128xf32>
    %17 = math.tanh %16 : vector<1x128xf32>
    %cst_13 = arith.constant 5.000000e-01 : f32
    %18 = vector.broadcast %cst_13 : f32 to vector<1x128xf32>
    %19 = arith.mulf %18, %17 : vector<1x128xf32>
    %cst_14 = arith.constant 5.000000e-01 : f32
    %20 = vector.broadcast %cst_14 : f32 to vector<1x128xf32>
    %21 = arith.addf %19, %20 : vector<1x128xf32>
    %c0_15 = arith.constant 0 : index
    %c0_16 = arith.constant 0 : index
    %22 = vector.load %arg6[%c0_15, %c0_16] : memref<1x128xf32, #tpu.memory_space<vmem>>, vector<1x128xf32>
    tpu.vector_store %arg6[%c0_15, %c0_16], %21 {strides = array<i32>} : memref<1x128xf32, #tpu.memory_space<vmem>>, vector<1x128xf32>,
    return
  }
  func.func @transform_0(%arg0: i32) -> (i32, i32) {
    %c0_i32 = arith.constant 0 : i32
    %c0_i32_0 = arith.constant 0 : i32
    return %c0_i32, %arg0 : i32, i32
  }
  func.func @transform_1(%arg0: i32) -> (i32, i32) {
    %c0_i32 = arith.constant 0 : i32
    %c0_i32_0 = arith.constant 0 : i32
    %c0_i32_1 = arith.constant 0 : i32
    return %c0_i32, %c0_i32_0 : i32, i32
  }
  func.func @transform_2(%arg0: i32) -> (i32, i32) {
    %c0_i32 = arith.constant 0 : i32
    %c0_i32_0 = arith.constant 0 : i32
    %c0_i32_1 = arith.constant 0 : i32
    return %c0_i32, %c0_i32_0 : i32, i32
  }
  func.func @transform_3(%arg0: i32) -> (i32, i32) {
    %c0_i32 = arith.constant 0 : i32
    %c0_i32_0 = arith.constant 0 : i32
    %c0_i32_1 = arith.constant 0 : i32
    return %c0_i32, %c0_i32_0 : i32, i32
  }
  func.func @transform_4(%arg0: i32) -> (i32, i32) {
    %c0_i32 = arith.constant 0 : i32
    %c0_i32_0 = arith.constant 0 : i32
    %c0_i32_1 = arith.constant 0 : i32
    return %c0_i32, %c0_i32_0 : i32, i32
  }
  func.func @transform_5(%arg0: i32) -> (i32, i32) {
    %c0_i32 = arith.constant 0 : i32
    %c0_i32_0 = arith.constant 0 : i32
    return %c0_i32, %arg0 : i32, i32
  }
}

</mosaic_0001>

<bundles_post_ra>
// kernel: tpu_custom_call.1
= control target key start
LH: loop header
LB: loop body
LE: loop exit
PB: predicated region body
PF: predicated region fallthrough
CT: control target
= control target key end

     0   :  { %s388_s0 = inlined_call_operand.vmem [shape: f32[10,128], index: 0, kind: input, shape index: {}]   ;;  %s389_s1 = inlined_call_operand.hbm [shape: f32[16,10], index: 1, kind: input, shape index: {}]   ;;  %s390_s2 = inlined_call_operand.vmem [shape: f32[16,1], index: 2, kind: input, shape index: {}]   ;;  %s391_s3 = inlined_call_operand.vmem [shape: f32[1,16], index: 3, kind: input, shape index: {}]   ;;  %s392_s4 = inlined_call_operand.<no memory space> [shape: f32[1,1], index: 4, kind: input, shape index: {}]   ;;  %s393_s5 = inlined_call_operand.hbm [shape: f32[1,128], index: 5, kind: output, shape index: {}]  }
   0x1   :  { %v10_v0 = vstv %s392_s4 }
   0x2   :  { %11 = vst [vmem:[#allocation2] sm:$0x1] %v10_v0 }
   0x3   :  { %12 = vsyncpa [#allocation4], 0 }
   0x4   :  { %13 = vsyncpa [#allocation5], 0  ;;  %s327_s20 = smov [#allocation3]  }
   0x5   :  { %s21_s21 = sshll.u32 %s327_s20, 4  ;;  %s22_s21 = int_to_ptr.vmem [resolvable:$true] %s21_s21 }
   0x6   :  { %s291_s22 = scalar_lea.vmem %s22_s21, 256  ;;  %p296_p1 = scmp.lt.s32.totalorder %s22_s21, %s22_s21 }
   0x7   :  { %p292_p0 = scmp.ne.s32.totalorder %s22_s21, %s291_s22  ;;  %p297_p2 = scmp.lt.s32.totalorder %s291_s22, %s291_s22 }
   0x9   :  { %p298_p3 = por %p297_p2, %p296_p1 }
   0xb   :  { %p299_p4 = pnand %p298_p3, %p292_p0 }
   0xd   :  { %302 = shalt.err (!%p299_p4)
}
   0xe   :  { %s328_s23 = smov 128   ;;  %s329_s24 = smov 8  }
   0xf   :  { %27 = dma.hbm_to_vmem [thread:$0]  %s389_s1, 256, %s22_s21, [#allocation4], %s328_s23, %s328_s23, %s329_s24  }
  0x10   :  { %323 = dma.done.wait [#allocation4], 256  }
  0x11   :  { %324 = vsyncadd [#allocation4], 4294967040  ;;  %v330_v1 = vmov 0   ;;  %vm60_vm0 = vcmask 1041408   ;;  %vm53_vm1 = vcmask 80896   ;;  %v37_v3 = vld [vmem:[%s388_s0] sm:$0xff]  ;;  %v148_v19 = vlaneseq }
  0x12   :  { %279 = vset.pattern.permute.xlu0 %v330_v1  ;;  %280 = vset.pattern.permute.xlu1 %v330_v1  ;;  %v38_v2 = vld [vmem:[%s388_s0 + $0x8] sm:$0x3]  ;;  %v41_v7 = vld [vmem:[%s390_s2] sm:$0xff]  ;;  %v331_v8 = vmov 0.0   ;;  %vm332_vm2 = vmmov 0   ;;  %vm152_vm3 = vcmask 130048  }
  0x13   :  { %v39_v4 = vld [vmem:[#allocation3] sm:$0xff]  ;;  %258 = vmatprep.subr.msk.mxu0 %vm60_vm0, %v38_v2  ;;  %v40_v6 = vld [vmem:[#allocation3 + $0x8] sm:$0xff]  ;;  %265 = vmatprep.subr.mxu1 %v331_v8  ;;  %v142_v9 = vld [vmem:[#allocation2] sm:$0x1]  ;;  %v149_v20 = vshrl.u32 %v148_v19, 7  ;;  %s333_s8 = smov [#allocation6]  }
  0x14   :  { %262 = vmatprep.mubr.msk.f32.mxu0 %vm53_vm1, %v39_v4  ;;  %v42_v5 = vld [vmem:[%s390_s2 + $0x8] sm:$0xff]  ;;  %259 = vmatpush3.msk.msra.mxu0 %vm60_vm0, %v38_v2  ;;  %v141_v18 = vld [vmem:[%s391_s3] sm:$0x1]  ;;  %s238_s9 = sshll.u32 %s333_s8, 4  ;;  %s239_s9 = int_to_ptr.vmem [resolvable:$true] %s238_s9 }
  0x15   :  { %50 = vperm.xlu0 %279, %v42_v5   ;;  %260 = vmatprep.subr.mxu0 %v37_v3  ;;  %v150_v21 = vsub.s32 0, %v149_v20  ;;  %s303_s3 = scalar_lea.vmem %s239_s9, 16  ;;  %s307_s10 = scalar_lea.vmem %s239_s9, 32 }
  0x16   :  { %261 = vmatpush3.msra.mxu0 %v37_v3  ;;  %269 = vmatprep.mubr.msk.f32.mxu1 %vm332_vm2, %v331_v8  ;;  %p304_p5 = scmp.ne.s32.totalorder %s239_s9, %s303_s3  ;;  %p308_p6 = scmp.lt.s32.totalorder %s239_s9, %s239_s9 }
  0x17   :  { %263 = vmatmul.mubr.msk.f32.vlgmr.msra.gmra.mxu0 %vm53_vm1, %v40_v6  ;;  %145 = vperm.xlu1 %280, %v142_v9   ;;  %p309_p7 = scmp.lt.s32.totalorder %s307_s10, %s303_s3 }
  0x19   :  { %45 = vperm.xlu0 %279, %v41_v7   ;;  %p310_p8 = por %p309_p7, %p308_p6 }
  0x1b   :  { %p311_p9 = pnand %p310_p8, %p304_p5 }
  0x90   :  { %v51_v10 = vpop.permute.xlu0 %50 }
  0x92   :  { %v146_v22 = vpop.permute.xlu1 %145 }
  0x93   :  { %v151_v23 = vrot.slane %v146_v22, %v150_v21 }
  0x94   :  { %v46_v13 = vpop.permute.xlu0 %45 }
  0xd7   :  { %v264_v11 = vpop.f32.mrf.mxu0 }
  0xd8   :  { %v136_v12 = vadd.f32 %v264_v11, %v51_v10 }
  0xd9   :  { %v130_v14 = vpop.f32.mrf.mxu0 }
  0xda   :  { %v140_v15 = vmax.f32 %v136_v12, 0.0  ;;  %v131_v16 = vadd.f32 %v130_v14, %v46_v13 }
  0xdc   :  { %v139_v17 = vmax.f32 %v131_v16, 0.0  ;;  %266 = vmatpush3.msra.mxu1 %v140_v15 }
  0xdd   :  { %267 = vmatprep.subr.mxu1 %v331_v8 }
  0xde   :  { %268 = vmatpush3.msra.mxu1 %v139_v17 }
  0xdf   :  { %270 = vmatmul.mubr.msk.f32.vlgmr.msra.gmra.mxu1 %vm152_vm3, %v141_v18 }
 0x19f   :  { %v222_v24 = vpop.f32.mrf.mxu1 }
 0x1a0   :  { %v223_v25 = vadd.f32 %v222_v24, %v151_v23 }
 0x1a1   :  { %v271_v26 = vpop.f32.mrf.mxu1 }
 0x1a2   :  { %v226_v27 = vmax.f32 %v223_v25, 0.0 }
 0x1a4   :  { %v227_v28 = vmul.f32 0.5, %v226_v27 }
 0x1a6   :  { %281 = vtanh.f32 %v227_v28 }
 0x1b3   :  { %v282_v29 = vpop.eup %281 }
 0x1b4   :  { %v229_v30 = vmul.f32 0.5, %v282_v29 }
 0x1b6   :  { %v230_v31 = vadd.f32 0.5, %v229_v30 }
 0x1b8   :  { %231 = vst [vmem:[#allocation6] sm:$0x1] %v230_v31 }
 0x1b9   :  { %314 = shalt.err (!%p311_p9)
}
 0x1ba   :  { %241 = dma.vmem_to_hbm [thread:$0]  %s239_s9, 16, %s393_s5, [#allocation5]  }
 0x1bb   :  { %325 = dma.done.wait [#allocation5], 16  }
 0x1bc   :  { %326 = vsyncadd [#allocation5], 4294967280 }
 0x1bd   :  { %245 = vsyncpa [#allocation4], 1 }
 0x1be   :  { %246 = vsyncpa [#allocation5], 1 }

</bundles_post_ra>
